<compile_context>
chip_gen: v5e
topology: v5e:2x2
jax: 0.10.0
libtpu: 0.0.40
codegen_flags: <defaults>
</compile_context>

<pallas_src>
import math

import numpy as np
import jax
import jax.numpy as jnp
from jax import lax
from jax.experimental import pallas as pl
from jax.experimental.pallas import tpu as pltpu


# ----------------------------------------------------------------------------
# Host-side glue: circuit unitary, Pauli observables, folded A_m matrices.
# ----------------------------------------------------------------------------
def _rx(t):
    c, s = np.cos(t / 2.0), np.sin(t / 2.0)
    return np.array([[c, -1j * s], [-1j * s, c]], dtype=np.complex128)


def _ry(t):
    c, s = np.cos(t / 2.0), np.sin(t / 2.0)
    return np.array([[c, -s], [s, c]], dtype=np.complex128)


def _rz(t):
    return np.array([[np.exp(-1j * t / 2.0), 0.0],
                     [0.0, np.exp(1j * t / 2.0)]], dtype=np.complex128)


def _single_qubit_full(gate, q, n):
    mats = [np.eye(2, dtype=np.complex128)] * n
    mats[q] = gate
    full = mats[0]
    for m in mats[1:]:
        full = np.kron(full, m)
    return full


def _cnot_full(control, target, n):
    dim = 2 ** n
    U = np.zeros((dim, dim), dtype=np.complex128)
    for idx in range(dim):
        if (idx >> (n - 1 - control)) & 1:
            out = idx ^ (1 << (n - 1 - target))
        else:
            out = idx
        U[out, idx] = 1.0
    return U


_PAULI = {
    "x": np.array([[0, 1], [1, 0]], dtype=np.complex128),
    "y": np.array([[0, -1j], [1j, 0]], dtype=np.complex128),
    "z": np.array([[1, 0], [0, -1]], dtype=np.complex128),
}


def build_circuit_unitary(weight, n_qubits, n_layers):
    """weight: (n_layers+1, 3*n_qubits) float array -> dense (2^n, 2^n) unitary."""
    dim = 2 ** n_qubits
    U = np.eye(dim, dtype=np.complex128)

    def apply(g):
        nonlocal U
        U = g @ U

    def xyz_layer(w):
        for q in range(n_qubits):
            apply(_single_qubit_full(_rx(w[3 * q + 0]), q, n_qubits))
            apply(_single_qubit_full(_ry(w[3 * q + 1]), q, n_qubits))
            apply(_single_qubit_full(_rz(w[3 * q + 2]), q, n_qubits))

    for layer in range(n_layers):
        xyz_layer(weight[layer])
        for q in range(n_qubits):                     # ring_of_cnot
            apply(_cnot_full(q, (q + 1) % n_qubits, n_qubits))
    xyz_layer(weight[-1])                             # final XYZLayer
    return U


def build_observables(n_qubits):
    """Order matches torch.cat([exp_x, exp_y, exp_z], dim=-1)."""
    obs = []
    for pauli in ("x", "y", "z"):
        for q in range(n_qubits):
            obs.append(_single_qubit_full(_PAULI[pauli], q, n_qubits))
    return np.stack(obs, axis=0)   # (M, D, D), M = 3*n_qubits


def build_folded_observables(U, P):
    """A_m = Re(U^H P_m U), stacked -> (M, D, D) real/symmetric."""
    # TODO(synk): qweight is baked in host-side; for training, this fold would
    # have to move into JAX to keep the circuit parameters differentiable.
    return np.real(np.einsum("ji,mjk,kl->mil", U.conj(), P, U))   # (M, D, D)


# ----------------------------------------------------------------------------
# Pallas kernel: Linear1 + ReLU -> (deferred-normalized) quadratic form with
#                the combined observable A_comb -> + b2.
# ----------------------------------------------------------------------------
def regression_kernel(x_ref, w1t_ref, b1_ref, a_ref, b2_ref, out_ref):
    # x_ref   (TB, in_dim)  f32   input features (per batch tile)       [VMEM]
    # w1t_ref (in_dim, D)   f32   first Linear weight, transposed       [VMEM]
    # b1_ref  (1, D)        f32   first Linear bias                     [VMEM]
    # a_ref   (D, D)        f32   A_comb = sum_m w2[m]*Re(U^H P_m U)    [VMEM]
    # b2_ref  (1, 1)        f32   final Linear bias                     [SMEM]
    # out_ref (TB, 1)       f32
    x = x_ref[...]

    # nn.Linear(input_dim, hidden_dim) + ReLU.
    h = jnp.dot(x, w1t_ref[...], preferred_element_type=jnp.float32) + b1_ref[...]
    h = jnp.maximum(h, 0.0)
    # TODO(synk): train-mode Dropout(0.1) (random masking) omitted; inference identity.

    # out = w2 . <P_m> + b2  with  <P_m> = (h^T A_m h)/||h||^2  folded into
    # A_comb host/wrapper-side, and normalization deferred to one reciprocal.
    ssq = jnp.sum(h * h, axis=-1, keepdims=True)                          # (TB, 1)
    z = jnp.dot(h, a_ref[...], preferred_element_type=jnp.float32)        # (TB, D)
    num = jnp.sum(z * h, axis=-1, keepdims=True)                          # (TB, 1)
    inv = pl.reciprocal(jnp.maximum(ssq, 1e-24), approx=True)             # EUP slot
    out_ref[...] = num * inv + b2_ref[0, 0]


def _batch_tile(batch):
    """Batch tile: big (amortize ~0.35us/step), sublane-aligned, and >=2 grid
    steps when the batch allows it so v7x's two TensorCores both get work."""
    if batch <= 8:
        return batch
    max_rows = 8192
    n_tiles = max(2, pl.cdiv(batch, max_rows))
    tb = pl.cdiv(batch, n_tiles)
    tb = ((tb + 7) // 8) * 8
    return min(tb, batch)


@jax.jit
def regression_forward(x, w1t, b1, a_stack, w2, b2):
    B, in_dim = x.shape
    D = w1t.shape[1]
    # Fold the final Linear(M,1) into the observable stack (tiny einsum, keeps
    # w2 a live JAX value).
    a_comb = jnp.einsum("m,mij->ij", w2.reshape(-1).astype(jnp.float32),
                        a_stack.astype(jnp.float32))                     # (D, D)

    tb = _batch_tile(B)
    grid = (pl.cdiv(B, tb),)
    return pl.pallas_call(
        regression_kernel,
        out_shape=jax.ShapeDtypeStruct((B, 1), jnp.float32),
        grid_spec=pltpu.PrefetchScalarGridSpec(
            num_scalar_prefetch=0,
            grid=grid,
            in_specs=[
                pl.BlockSpec((tb, in_dim), lambda b: (b, 0)),     # x (batch-tiled)
                pl.BlockSpec((in_dim, D), lambda b: (0, 0)),      # W1^T
                pl.BlockSpec((1, D), lambda b: (0, 0)),           # b1
                pl.BlockSpec((D, D), lambda b: (0, 0)),           # A_comb
                pl.BlockSpec(memory_space=pltpu.MemorySpace.SMEM),  # b2 scalar
            ],
            out_specs=pl.BlockSpec((tb, 1), lambda b: (b, 0)),
        ),
        compiler_params=pltpu.CompilerParams(
            dimension_semantics=("parallel",)),           # v7x: 2 TCs split batch
    )(x, w1t, b1, a_comb, b2)


# ----------------------------------------------------------------------------
if __name__ == "__main__":
    input_dim = 32
    hidden_dim = 16                      # 2**4 -> n_qubits = 4, qulinear_out = 12
    n_layers = 5
    n_qubits = int(math.log(hidden_dim, 2))
    M = 3 * n_qubits
    D = 2 ** n_qubits
    batch = 8

    key = jax.random.PRNGKey(0)
    kx, kw1, kb1, kq, kw2, kb2 = jax.random.split(key, 6)
    x = jax.random.normal(kx, (batch, input_dim), dtype=jnp.float32)

    lim1 = 1.0 / math.sqrt(input_dim)
    w1 = jax.random.uniform(kw1, (hidden_dim, input_dim),
                            minval=-lim1, maxval=lim1, dtype=jnp.float32)
    b1 = jax.random.uniform(kb1, (hidden_dim,),
                            minval=-lim1, maxval=lim1, dtype=jnp.float32)
    # QuLinear weight: uniform(0, 2*pi), shape (n_layers+1, 3*n_qubits)
    qweight = jax.random.uniform(kq, (n_layers + 1, 3 * n_qubits),
                                 minval=0.0, maxval=2.0 * math.pi,
                                 dtype=jnp.float32)
    lim2 = 1.0 / math.sqrt(M)
    w2 = jax.random.uniform(kw2, (1, M), minval=-lim2, maxval=lim2,
                            dtype=jnp.float32)
    b2 = jax.random.uniform(kb2, (1,), minval=-lim2, maxval=lim2,
                            dtype=jnp.float32)

    # Host-side fold of the variational circuit + Pauli measurements.
    U = build_circuit_unitary(np.asarray(qweight, np.float64), n_qubits, n_layers)
    P = build_observables(n_qubits)                       # (M, D, D) complex
    A_stack = build_folded_observables(U, P)              # (M, D, D) real

    w1t = jnp.asarray(np.asarray(w1, np.float32).T)                  # (in_dim, D)
    b1v = jnp.asarray(b1, jnp.float32).reshape(1, D)
    a_stack = jnp.asarray(A_stack, jnp.float32)                      # (M, D, D)
    b2v = jnp.asarray(b2, jnp.float32).reshape(1, 1)

    out = jax.block_until_ready(
        regression_forward(x, w1t, b1v, a_stack, w2, b2v))
    assert out.shape == (batch, 1)

    # float64 / complex128 reference of the full module forward (Dropout = id).
    xh = np.asarray(x, np.float64)
    h = np.maximum(xh @ np.asarray(w1, np.float64).T + np.asarray(b1, np.float64), 0.0)
    hn = h / np.maximum(np.linalg.norm(h, axis=-1, keepdims=True), 1e-12)
    psi = hn.astype(np.complex128) @ U.T
    exp = np.stack([np.real(np.einsum("bi,ij,bj->b", psi.conj(), P[mm], psi))
                    for mm in range(P.shape[0])], axis=-1)                # (B, M)
    ref = exp @ np.asarray(w2, np.float64).T + np.asarray(b2, np.float64)  # (B, 1)

    np.testing.assert_allclose(np.asarray(out, np.float64), ref, atol=1e-2, rtol=0)
    print("KERNEL_OK")
</pallas_src>

<mosaic_0001>
module attributes {stable_mosaic.version = 11 : i64} {
  func.func @regression_kernel(%arg0: i32, %arg1: memref<8x32xf32, #tpu.memory_space<vmem>>, %arg2: memref<32x16xf32, #tpu.memory_space<vmem>>, %arg3: memref<1x16xf32, #tpu.memory_space<vmem>>, %arg4: memref<16x16xf32, #tpu.memory_space<vmem>>, %arg5: memref<1x1xf32, #tpu.memory_space<smem>>, %arg6: memref<8x1xf32, #tpu.memory_space<vmem>>) attributes {dimension_semantics = [#tpu.dimension_semantics<parallel>], iteration_bounds = array<i64: 1>, scalar_prefetch = 0 : i64, scratch_operands = 0 : i64, tpu.core_type = #tpu.core_type<tc>, window_params = [{transform_indices = @transform_0, window_bounds = array<i64: 8, 32>}, {pipeline_mode = #tpu.pipeline_mode<synchronous>, transform_indices = @transform_1, window_bounds = array<i64: 32, 16>}, {pipeline_mode = #tpu.pipeline_mode<synchronous>, transform_indices = @transform_2, window_bounds = array<i64: 1, 16>}, {pipeline_mode = #tpu.pipeline_mode<synchronous>, transform_indices = @transform_3, window_bounds = array<i64: 16, 16>}, {transform_indices = @transform_4, window_bounds = array<i64: 1, 1>}, {transform_indices = @transform_5, window_bounds = array<i64: 8, 1>}]} {
    %c0 = arith.constant 0 : index
    %c0_0 = arith.constant 0 : index
    %0 = vector.load %arg1[%c0, %c0_0] : memref<8x32xf32, #tpu.memory_space<vmem>>, vector<8x32xf32>
    %c0_1 = arith.constant 0 : index
    %c0_2 = arith.constant 0 : index
    %1 = vector.load %arg2[%c0_1, %c0_2] : memref<32x16xf32, #tpu.memory_space<vmem>>, vector<32x16xf32>
    %cst = arith.constant dense<0.000000e+00> : vector<8x16xf32>
    %2 = tpu.matmul %0, %1, %cst {dimension_numbers = #tpu.dot_dimension_numbers<[1], [0], [0], [1], [0, 0, 1, 1], [], []>} : vector<8x32xf32>, vector<32x16xf32>, vector<8x16xf32> -> vector<8x16xf32>
    %c0_3 = arith.constant 0 : index
    %c0_4 = arith.constant 0 : index
    %3 = vector.load %arg3[%c0_3, %c0_4] : memref<1x16xf32, #tpu.memory_space<vmem>>, vector<1x16xf32>
    %4 = vector.broadcast %3 : vector<1x16xf32> to vector<8x16xf32>
    %5 = arith.addf %2, %4 : vector<8x16xf32>
    %cst_5 = arith.constant 0.000000e+00 : f32
    %6 = vector.broadcast %cst_5 : f32 to vector<8x16xf32>
    %7 = arith.maximumf %5, %6 : vector<8x16xf32>
    %8 = arith.mulf %7, %7 : vector<8x16xf32>
    %cst_6 = arith.constant dense<0.000000e+00> : vector<8xf32>
    %9 = vector.multi_reduction <add>, %8, %cst_6 [1] : vector<8x16xf32> to vector<8xf32>
    %10 = vector.shape_cast %9 : vector<8xf32> to vector<8x1xf32>
    %c0_7 = arith.constant 0 : index
    %c0_8 = arith.constant 0 : index
    %11 = vector.load %arg4[%c0_7, %c0_8] : memref<16x16xf32, #tpu.memory_space<vmem>>, vector<16x16xf32>
    %cst_9 = arith.constant dense<0.000000e+00> : vector<8x16xf32>
    %12 = tpu.matmul %7, %11, %cst_9 {dimension_numbers = #tpu.dot_dimension_numbers<[1], [0], [0], [1], [0, 0, 1, 1], [], []>} : vector<8x16xf32>, vector<16x16xf32>, vector<8x16xf32> -> vector<8x16xf32>
    %13 = arith.mulf %12, %7 : vector<8x16xf32>
    %cst_10 = arith.constant dense<0.000000e+00> : vector<8xf32>
    %14 = vector.multi_reduction <add>, %13, %cst_10 [1] : vector<8x16xf32> to vector<8xf32>
    %15 = vector.shape_cast %14 : vector<8xf32> to vector<8x1xf32>
    %cst_11 = arith.constant 1.000000e-24 : f32
    %16 = vector.broadcast %cst_11 : f32 to vector<8x1xf32>
    %17 = arith.maximumf %10, %16 : vector<8x1xf32>
    %18 = tpu.reciprocal %17 {approx = true} : vector<8x1xf32> -> vector<8x1xf32>
    %19 = arith.mulf %15, %18 : vector<8x1xf32>
    %c0_12 = arith.constant 0 : index
    %c0_13 = arith.constant 0 : index
    %20 = memref.load %arg5[%c0_12, %c0_13] : memref<1x1xf32, #tpu.memory_space<smem>>
    %21 = vector.broadcast %20 : f32 to vector<8x1xf32>
    %22 = arith.addf %19, %21 : vector<8x1xf32>
    %c0_14 = arith.constant 0 : index
    %c0_15 = arith.constant 0 : index
    %23 = vector.load %arg6[%c0_14, %c0_15] : memref<8x1xf32, #tpu.memory_space<vmem>>, vector<8x1xf32>
    tpu.vector_store %arg6[%c0_14, %c0_15], %22 {strides = array<i32>} : memref<8x1xf32, #tpu.memory_space<vmem>>, vector<8x1xf32>,
    return
  }
  func.func @transform_0(%arg0: i32) -> (i32, i32) {
    %c0_i32 = arith.constant 0 : i32
    %c0_i32_0 = arith.constant 0 : i32
    return %arg0, %c0_i32 : i32, i32
  }
  func.func @transform_1(%arg0: i32) -> (i32, i32) {
    %c0_i32 = arith.constant 0 : i32
    %c0_i32_0 = arith.constant 0 : i32
    %c0_i32_1 = arith.constant 0 : i32
    return %c0_i32, %c0_i32_0 : i32, i32
  }
  func.func @transform_2(%arg0: i32) -> (i32, i32) {
    %c0_i32 = arith.constant 0 : i32
    %c0_i32_0 = arith.constant 0 : i32
    %c0_i32_1 = arith.constant 0 : i32
    return %c0_i32, %c0_i32_0 : i32, i32
  }
  func.func @transform_3(%arg0: i32) -> (i32, i32) {
    %c0_i32 = arith.constant 0 : i32
    %c0_i32_0 = arith.constant 0 : i32
    %c0_i32_1 = arith.constant 0 : i32
    return %c0_i32, %c0_i32_0 : i32, i32
  }
  func.func @transform_4(%arg0: i32) -> (i32, i32) {
    %c0_i32 = arith.constant 0 : i32
    %c0_i32_0 = arith.constant 0 : i32
    %c0_i32_1 = arith.constant 0 : i32
    return %c0_i32, %c0_i32_0 : i32, i32
  }
  func.func @transform_5(%arg0: i32) -> (i32, i32) {
    %c0_i32 = arith.constant 0 : i32
    %c0_i32_0 = arith.constant 0 : i32
    return %arg0, %c0_i32 : i32, i32
  }
}

</mosaic_0001>

<bundles_post_ra>
// kernel: regression_forward.1
= control target key start
LH: loop header
LB: loop body
LE: loop exit
PB: predicated region body
PF: predicated region fallthrough
CT: control target
= control target key end

     0   :  { %vm30_vm0 = vcmask 261120   ;;  %vm56_vm1 = vcmask 130048   ;;  %vm95_vm2 = vcmask 7168   ;;  %s166_s1 = inlined_call_operand.vmem [shape: f32[32,16], index: 1, kind: input, shape index: {}]   ;;  %s167_s2 = inlined_call_operand.vmem [shape: f32[1,16], index: 2, kind: input, shape index: {}]   ;;  %s168_s0 = inlined_call_operand.vmem [shape: f32[8,32], index: 0, kind: input, shape index: {}]   ;;  %s169_s3 = inlined_call_operand.vmem [shape: f32[16,16], index: 3, kind: input, shape index: {}]   ;;  %s170_s4 = inlined_call_operand.<no memory space> [shape: f32[1,1], index: 4, kind: input, shape index: {}]   ;;  %s171_s5 = inlined_call_operand.vmem [shape: f32[8,1], index: 5, kind: output, shape index: {}]  }
   0x1   :  { %v25_v0 = vld [vmem:[%s166_s1 + $0x18] sm:$0xff]  ;;  %v24_v1 = vld [vmem:[%s166_s1 + $0x10] sm:$0xff]  ;;  %v23_v2 = vld [vmem:[%s166_s1 + $0x8] sm:$0xff]  ;;  %v93_v19 = vstv %s170_s4 }
   0x2   :  { %46 = vmatpush.msra.mxu0 %v25_v0  ;;  %v22_v3 = vld [vmem:[%s166_s1] sm:$0xff]  ;;  %v61_v5 = vld [vmem:[%s169_s3 + $0x8] sm:$0xff] }
   0x3   :  { %v21_v4 = vld [vmem:[%s168_s0] sm:$0xff]  ;;  %79 = vmatpush.msra.mxu1 %v61_v5 }
   0x4   :  { %47 = vmatpush.msra.mxu0 %v24_v1  ;;  %v60_v6 = vld [vmem:[%s169_s3] sm:$0xff] }
   0x5   :  { %80 = vmatpush.msra.mxu1 %v60_v6  ;;  %v103_v7 = vld [vmem:[%s167_s2] ss:$0 sm:$0xff] }
   0x6   :  { %48 = vmatpush.msra.mxu0 %v23_v2 }
   0x8   :  { %49 = vmatpush.msra.mxu0 %v22_v3 }
   0x9   :  { %101 = vmatmul.msk.f32.vlgmr.msra.gmra.mxu0 %vm30_vm0, %v21_v4 }
  0x86   :  { %v51_v8 = vpop.f32.mrf.mxu0 }
  0x87   :  { %v52_v9 = vadd.f32 %v103_v7, %v51_v8 }
  0x89   :  { %v54_v10 = vmax.f32 %v52_v9, 0.0 }
  0x8b   :  { %102 = vmatmul.msk.f32.vlgmr.msra.gmra.mxu1 %vm56_vm1, %v54_v10  ;;  %v55_v11 = vmul.f32 %v54_v10, %v54_v10 }
  0x8d   :  { %v57_v12 = vsel %vm56_vm1, %v55_v11, 0.0 }
  0x8e   :  { %58 = vadd.xlane.f32.xlu0 %v57_v12 }
 0x101   :  { %v59_v16 = vpop.xlane.xlu0 %58 }
 0x102   :  { %v89_v17 = vmax.f32 %v59_v16, 1e-24 }
 0x104   :  { %104 = vrcp.f32 %v89_v17 }
 0x108   :  { %v82_v13 = vpop.f32.mrf.mxu1 }
 0x109   :  { %v85_v14 = vmul.f32 %v82_v13, %v54_v10 }
 0x10a   :  { %v105_v18 = vpop.eup %104 }
 0x10b   :  { %v86_v15 = vsel %vm56_vm1, %v85_v14, 0.0 }
 0x10c   :  { %87 = vadd.xlane.f32.xlu0 %v86_v15 }
 0x17f   :  { %v88_v20 = vpop.xlane.xlu0 %87 }
 0x180   :  { %v91_v21 = vmul.f32 %v105_v18, %v88_v20 }
 0x182   :  { %v94_v22 = vadd.f32 %v93_v19, %v91_v21 }
 0x184   :  { %96 = vst.msk [vmem:[%s171_s5] sm:$0xff] %vm95_vm2, %v94_v22 }

</bundles_post_ra>
